<compile_context>
chip_gen: v7x
topology: tpu7x:2x2x1
jax: 0.10.0
libtpu: 0.0.40
codegen_flags: <defaults>
</compile_context>

<pallas_src>
import functools

import jax
import jax.numpy as jnp
from jax.experimental import pallas as pl
from jax.experimental.pallas import tpu as pltpu

EPS = 1e-5  # InstanceNorm1d default eps


def residual_kernel(x_ref, wf_ref, bf_ref, w2_ref, b2_ref, m_ref, o_ref, *, bblk, mxu_dtype):
    C = w2_ref.shape[0]
    N = x_ref.shape[1]          # N = bblk * T lanes
    T = N // bblk

    # Hoisted boundary masks for the +-1 taps of the k=3 convs (zero at batch-segment edges),
    # cast once to the MXU operand dtype since they multiply the already-cast taps.
    m_prev = m_ref[0:1, :].astype(mxu_dtype)   # (1, N): 0 where t == 0
    m_next = m_ref[1:2, :].astype(mxu_dtype)   # (1, N): 0 where t == T-1

    def inorm_silu(a):
        # InstanceNorm1d (no affine, biased variance) + SiLU, per (channel, batch) segment.
        # Segments are T consecutive lanes (T % 128 == 0), so slices / concat stay aligned.
        outs = []
        for b in range(bblk):
            seg = a if bblk == 1 else a[:, b * T:(b + 1) * T]
            mean = jnp.mean(seg, axis=1, keepdims=True)
            ctr = seg - mean
            var = jnp.mean(ctr * ctr, axis=1, keepdims=True)
            n = ctr * jax.lax.rsqrt(var + EPS)
            outs.append(n * jax.nn.sigmoid(n))
        return outs[0] if bblk == 1 else jnp.concatenate(outs, axis=1)

    def taps3(h):
        # Stack [h[t-1], h[t], h[t+1]] along channels -> (3C, N) in the MXU operand dtype.
        hm = h.astype(mxu_dtype)                     # cast once (not the 3x larger tap stack)
        prev = pltpu.roll(hm, shift=1, axis=1) * m_prev
        nxt = pltpu.roll(hm, shift=N - 1, axis=1) * m_next
        return jnp.concatenate([prev, hm, nxt], axis=0)

    h = inorm_silu(x_ref[...].astype(jnp.float32))   # shared by conv1 and the 1x1 shortcut

    # Stage 1: conv1 (k=3, pad=1) and the 1x1 shortcut fused into ONE wide matmul.
    yf = jnp.dot(wf_ref[...], taps3(h), preferred_element_type=jnp.float32) + bf_ref[...]
    y1, res = yf[:C, :], yf[C:, :]

    # Stage 2: conv2 (k=3, pad=1) on silu(instance_norm(y1)).
    y2 = jnp.dot(w2_ref[...], taps3(inorm_silu(y1)),
                 preferred_element_type=jnp.float32) + b2_ref[...]

    o_ref[...] = (res + y2).astype(o_ref.dtype)


def _fuse_params(params, C, mxu_dtype):
    """Concatenate the k=3 taps and the zero-padded 1x1 shortcut into wide weight matrices."""
    w1, b1, w2, b2, ws, bs = params  # PyTorch Conv1d layouts: (Cout, Cin, K)
    # taps3 channel-row order is [x[t-1]; x[t]; x[t+1]]  ->  conv taps k = 0, 1, 2.
    w1cat = jnp.concatenate([w1[:, :, 0], w1[:, :, 1], w1[:, :, 2]], axis=1)   # (C, 3C)
    zero = jnp.zeros((C, C), w1.dtype)
    wscat = jnp.concatenate([zero, ws[:, :, 0], zero], axis=1)                 # (C, 3C): centre tap
    wfirst = jnp.concatenate([w1cat, wscat], axis=0).astype(mxu_dtype)         # (2C, 3C): [conv1 ; shortcut]
    bfirst = jnp.concatenate([b1, bs], axis=0)[:, None].astype(jnp.float32)    # (2C, 1)
    w2cat = jnp.concatenate([w2[:, :, 0], w2[:, :, 1], w2[:, :, 2]],
                            axis=1).astype(mxu_dtype)                          # (C, 3C)
    b2c = b2[:, None].astype(jnp.float32)                                      # (C, 1)
    return wfirst, bfirst, w2cat, b2c


def residual_forward(x, params, *, bblk=None, mxu_dtype=None):
    """x: (B, C, T); params = (w1, b1, w2, b2, ws, bs) in PyTorch Conv1d layouts."""
    B, C, T = x.shape
    assert T >= 2, "k=3 convolution taps assume T >= 2"
    # Note: C a multiple of 8 keeps the channel concat / row-split relayout-free (still correct
    # otherwise, just slower).

    # bf16 MXU operands only when the contraction (3C) is large enough to be MXU-limited;
    # at small C the kernel is VPU/XLU-bound and the casts would be pure overhead.
    if mxu_dtype is None:
        mxu_dtype = jnp.bfloat16 if 3 * C >= 256 else jnp.float32
    wfirst, bfirst, w2cat, b2c = _fuse_params(params, C, mxu_dtype)

    x_item = jnp.dtype(x.dtype).itemsize
    w_bytes = ((wfirst.size + w2cat.size) * jnp.dtype(mxu_dtype).itemsize
               + (bfirst.size + b2c.size) * 4)

    def est_vmem(d):
        n = d * T
        # double-buffered in/out blocks + ~16 live f32 (C, n) intermediates + consts/masks
        return C * n * (4 * x_item + 16 * 4) + 2 * (w_bytes + 2 * n * 4)

    # Per-generation VMEM budget (v5e/v6e: 128 MiB -> ~96 MiB; v7x: 64 MiB -> ~48 MiB).
    try:
        vmem_cap = int(pltpu.get_tpu_info().vmem_capacity_bytes)
    except Exception:
        vmem_cap = 64 << 20
    budget = min(int(0.75 * vmem_cap), 100 << 20)
    try:
        kind = jax.devices()[0].device_kind.lower()
    except Exception:
        kind = ""
    single_core = any(v in kind for v in ("v5", "v6"))   # v7x has 2 TensorCores per chip

    if bblk is None:
        cands = [d for d in range(1, B + 1)
                 if B % d == 0 and (d == B or (d * T) % 128 == 0) and est_vmem(d) <= budget]
        if not cands:
            cands = [1 if (T % 128 == 0 or B == 1) else B]
        if single_core or B == 1:
            bblk = max(cands)                      # serial grid: biggest fitting block wins
        else:
            even = [d for d in cands if B // d >= 2 and (B // d) % 2 == 0]
            multi = [d for d in cands if B // d >= 2]
            bblk = max(even or multi or cands)     # keep both TensorCores busy on v7x
    assert B % bblk == 0, "bblk must divide the batch size"
    N = bblk * T
    grid = (B // bblk,)
    vmem_limit = int(min(vmem_cap, max(32 << 20, est_vmem(bblk) + (8 << 20))))

    # Boundary masks for the +-1 taps: zero where the shift would cross a batch-segment edge.
    tpos = jnp.arange(N, dtype=jnp.int32) % T
    tmask = jnp.stack([(tpos != 0), (tpos != T - 1)]).astype(jnp.float32)      # (2, N)

    # Layout plumbing (wrapper side, per review): fold batch into the lane axis -> (C, B*T)
    # slab so the kernel's matmul N axis is bblk*T-wide and the output store is lane dense.
    # TODO(synk): keep x/out in bf16 in HBM if the surrounding pipeline allows (halves kernel I/O).
    xr = jnp.transpose(x, (1, 0, 2)).reshape(C, B * T)

    kernel = functools.partial(residual_kernel, bblk=bblk, mxu_dtype=mxu_dtype)

    def run(single_buffer_consts):
        if single_buffer_consts:
            const = lambda shape: pl.BlockSpec(shape, lambda i, _n=len(shape): (0,) * _n,
                                               pipeline_mode=pl.Buffered(1))
        else:
            const = lambda shape: pl.BlockSpec(shape, lambda i, _n=len(shape): (0,) * _n)
        return pl.pallas_call(
            kernel,
            out_shape=jax.ShapeDtypeStruct((C, B * T), x.dtype),
            grid=grid,
            in_specs=[
                pl.BlockSpec((C, N), lambda i: (0, i)),            # x slab: bblk batch segments
                const((2 * C, 3 * C)), const((2 * C, 1)),          # fused conv1+shortcut weight / bias
                const((C, 3 * C)), const((C, 1)),                  # fused conv2 weight / bias
                const((2, N)),                                     # tap boundary masks
            ],
            out_specs=pl.BlockSpec((C, N), lambda i: (0, i)),
            compiler_params=pltpu.CompilerParams(
                dimension_semantics=("parallel",),
                vmem_limit_bytes=vmem_limit,
            ),
        )(xr, wfirst, bfirst, w2cat, b2c, tmask)

    try:
        out2d = run(True)     # single-buffer grid-invariant operands (VMEM headroom on v7x)
    except Exception:
        out2d = run(False)    # fallback if pl.Buffered(1) is rejected by this jax build

    return out2d.reshape(C, B, T).transpose(1, 0, 2)


# ---------------- pure-JAX reference (correctness check only) ----------------
def _ref_inorm_silu(a):
    mean = a.mean(axis=2, keepdims=True)
    var = ((a - mean) ** 2).mean(axis=2, keepdims=True)
    n = (a - mean) / jnp.sqrt(var + EPS)
    return n * jax.nn.sigmoid(n)


def _ref_conv1d(a, w, b, pad, mxu_dtype):
    out = jax.lax.conv_general_dilated(
        a.astype(mxu_dtype), w.astype(mxu_dtype),
        window_strides=(1,), padding=[(pad, pad)],
        dimension_numbers=("NCH", "OIH", "NCH"),
        preferred_element_type=jnp.float32,
        precision=jax.lax.Precision.HIGHEST)
    return out + b[None, :, None]


def residual_reference(x, params, mxu_dtype=jnp.float32):
    w1, b1, w2, b2, ws, bs = params
    h = _ref_inorm_silu(x)
    res = _ref_conv1d(h, ws, bs, 0, mxu_dtype)
    y1 = _ref_conv1d(h, w1, b1, 1, mxu_dtype)
    y2 = _ref_conv1d(_ref_inorm_silu(y1), w2, b2, 1, mxu_dtype)
    return res + y2


if __name__ == "__main__":
    B, C, T = 2, 8, 128   # small shapes: batch=2, n_channels=8, time=128 (lane-aligned)
    key = jax.random.PRNGKey(0)
    kx, k1, kb1, k2, kb2, ks, kbs = jax.random.split(key, 7)

    x = jax.random.normal(kx, (B, C, T), jnp.float32)
    # Deterministic synthetic parameters (PyTorch Conv1d layouts: (out, in, kernel)).
    w1 = 0.2 * jax.random.normal(k1, (C, C, 3), jnp.float32)
    b1 = 0.1 * jax.random.normal(kb1, (C,), jnp.float32)
    w2 = 0.2 * jax.random.normal(k2, (C, C, 3), jnp.float32)
    b2 = 0.1 * jax.random.normal(kb2, (C,), jnp.float32)
    ws = 0.2 * jax.random.normal(ks, (C, C, 1), jnp.float32)
    bs = 0.1 * jax.random.normal(kbs, (C,), jnp.float32)
    params = (w1, b1, w2, b2, ws, bs)

    # f32 MXU operands (auto-selected at this small C): tight check vs the pure-JAX reference.
    out_f32 = residual_forward(x, params)
    jax.block_until_ready(out_f32)
    ref_f32 = residual_reference(x, params, jnp.float32)
    err_f32 = float(jnp.max(jnp.abs(out_f32 - ref_f32)))
    assert err_f32 < 3e-4, f"f32 mismatch vs reference, max abs err = {err_f32}"

    # Larger batch: exercises multi-segment blocks and/or multi-step grids.
    x4 = jax.random.normal(kx, (4, C, T), jnp.float32)
    out4 = residual_forward(x4, params)
    jax.block_until_ready(out4)
    ref4 = residual_reference(x4, params, jnp.float32)
    err4 = float(jnp.max(jnp.abs(out4 - ref4)))
    assert err4 < 3e-4, f"f32 (B=4) mismatch vs reference, max abs err = {err4}"

    # bf16 MXU operands (what large C would auto-select): check vs a bf16-operand reference.
    out_bf16 = residual_forward(x, params, mxu_dtype=jnp.bfloat16)
    jax.block_until_ready(out_bf16)
    ref_bf16 = residual_reference(x, params, jnp.bfloat16)
    err_bf16 = float(jnp.max(jnp.abs(out_bf16 - ref_bf16)))
    assert err_bf16 < 2e-2, f"bf16 mismatch vs bf16 reference, max abs err = {err_bf16}"

    print("KERNEL_OK")
</pallas_src>

<mosaic_0001>
module attributes {stable_mosaic.version = 11 : i64} {
  func.func @residual_kernel(%arg0: i32, %arg1: memref<8x128xf32, #tpu.memory_space<vmem>>, %arg2: memref<16x24xf32, #tpu.memory_space<vmem>>, %arg3: memref<16x1xf32, #tpu.memory_space<vmem>>, %arg4: memref<8x24xf32, #tpu.memory_space<vmem>>, %arg5: memref<8x1xf32, #tpu.memory_space<vmem>>, %arg6: memref<2x128xf32, #tpu.memory_space<vmem>>, %arg7: memref<8x128xf32, #tpu.memory_space<vmem>>) attributes {dimension_semantics = [#tpu.dimension_semantics<parallel>], iteration_bounds = array<i64: 2>, scalar_prefetch = 0 : i64, scratch_operands = 0 : i64, tpu.core_type = #tpu.core_type<tc>, window_params = [{transform_indices = @transform_0, window_bounds = array<i64: 8, 128>}, {pipeline_mode = #tpu.pipeline_mode<synchronous>, transform_indices = @transform_1, window_bounds = array<i64: 16, 24>}, {pipeline_mode = #tpu.pipeline_mode<synchronous>, transform_indices = @transform_2, window_bounds = array<i64: 16, 1>}, {pipeline_mode = #tpu.pipeline_mode<synchronous>, transform_indices = @transform_3, window_bounds = array<i64: 8, 24>}, {pipeline_mode = #tpu.pipeline_mode<synchronous>, transform_indices = @transform_4, window_bounds = array<i64: 8, 1>}, {pipeline_mode = #tpu.pipeline_mode<synchronous>, transform_indices = @transform_5, window_bounds = array<i64: 2, 128>}, {transform_indices = @transform_6, window_bounds = array<i64: 8, 128>}]} {
    %c0 = arith.constant 0 : index
    %c0_0 = arith.constant 0 : index
    %0 = vector.load %arg6[%c0, %c0_0] : memref<2x128xf32, #tpu.memory_space<vmem>>, vector<1x128xf32>
    %c1 = arith.constant 1 : index
    %c0_1 = arith.constant 0 : index
    %1 = vector.load %arg6[%c1, %c0_1] : memref<2x128xf32, #tpu.memory_space<vmem>>, vector<1x128xf32>
    %c0_2 = arith.constant 0 : index
    %c0_3 = arith.constant 0 : index
    %2 = vector.load %arg1[%c0_2, %c0_3] : memref<8x128xf32, #tpu.memory_space<vmem>>, vector<8x128xf32>
    %cst = arith.constant dense<0.000000e+00> : vector<8xf32>
    %3 = vector.multi_reduction <add>, %2, %cst [1] : vector<8x128xf32> to vector<8xf32>
    %4 = vector.shape_cast %3 : vector<8xf32> to vector<8x1xf32>
    %cst_4 = arith.constant 1.280000e+02 : f32
    %5 = vector.broadcast %cst_4 : f32 to vector<8x1xf32>
    %6 = arith.divf %4, %5 : vector<8x1xf32>
    %7 = vector.broadcast %6 : vector<8x1xf32> to vector<8x128xf32>
    %8 = arith.subf %2, %7 : vector<8x128xf32>
    %9 = arith.mulf %8, %8 : vector<8x128xf32>
    %cst_5 = arith.constant dense<0.000000e+00> : vector<8xf32>
    %10 = vector.multi_reduction <add>, %9, %cst_5 [1] : vector<8x128xf32> to vector<8xf32>
    %11 = vector.shape_cast %10 : vector<8xf32> to vector<8x1xf32>
    %cst_6 = arith.constant 1.280000e+02 : f32
    %12 = vector.broadcast %cst_6 : f32 to vector<8x1xf32>
    %13 = arith.divf %11, %12 : vector<8x1xf32>
    %cst_7 = arith.constant 9.99999974E-6 : f32
    %14 = vector.broadcast %cst_7 : f32 to vector<8x1xf32>
    %15 = arith.addf %13, %14 : vector<8x1xf32>
    %16 = math.rsqrt %15 : vector<8x1xf32>
    %17 = vector.broadcast %16 : vector<8x1xf32> to vector<8x128xf32>
    %18 = arith.mulf %8, %17 : vector<8x128xf32>
    %19 = arith.negf %18 : vector<8x128xf32>
    %20 = math.exp %19 : vector<8x128xf32>
    %cst_8 = arith.constant 1.000000e+00 : f32
    %21 = vector.broadcast %cst_8 : f32 to vector<8x128xf32>
    %22 = arith.addf %21, %20 : vector<8x128xf32>
    %23 = arith.divf %21, %22 : vector<8x128xf32>
    %24 = arith.mulf %18, %23 : vector<8x128xf32>
    %c0_9 = arith.constant 0 : index
    %c0_10 = arith.constant 0 : index
    %25 = vector.load %arg2[%c0_9, %c0_10] : memref<16x24xf32, #tpu.memory_space<vmem>>, vector<16x24xf32>
    %c1_i32 = arith.constant 1 : i32
    %26 = tpu.dynamic_rotate %24 by %c1_i32 dim 1 : vector<8x128xf32>, i32 -> vector<8x128xf32>
    %27 = vector.broadcast %0 : vector<1x128xf32> to vector<8x128xf32>
    %28 = arith.mulf %26, %27 : vector<8x128xf32>
    %c127_i32 = arith.constant 127 : i32
    %29 = tpu.dynamic_rotate %24 by %c127_i32 dim 1 : vector<8x128xf32>, i32 -> vector<8x128xf32>
    %30 = vector.broadcast %1 : vector<1x128xf32> to vector<8x128xf32>
    %31 = arith.mulf %29, %30 : vector<8x128xf32>
    %32 = tpu.concatenate %28, %24, %31 in 0 : vector<8x128xf32>, vector<8x128xf32>, vector<8x128xf32> -> vector<24x128xf32>
    %cst_11 = arith.constant dense<0.000000e+00> : vector<16x128xf32>
    %33 = tpu.matmul %25, %32, %cst_11 {dimension_numbers = #tpu.dot_dimension_numbers<[1], [0], [0], [1], [0, 0, 1, 1], [], []>} : vector<16x24xf32>, vector<24x128xf32>, vector<16x128xf32> -> vector<16x128xf32>
    %c0_12 = arith.constant 0 : index
    %c0_13 = arith.constant 0 : index
    %34 = vector.load %arg3[%c0_12, %c0_13] : memref<16x1xf32, #tpu.memory_space<vmem>>, vector<16x1xf32>
    %35 = vector.broadcast %34 : vector<16x1xf32> to vector<16x128xf32>
    %36 = arith.addf %33, %35 : vector<16x128xf32>
    %37 = vector.extract_strided_slice %36 {offsets = [0, 0], sizes = [8, 128], strides = [1, 1]} : vector<16x128xf32> to vector<8x128xf32>
    %38 = vector.extract_strided_slice %36 {offsets = [8, 0], sizes = [8, 128], strides = [1, 1]} : vector<16x128xf32> to vector<8x128xf32>
    %c0_14 = arith.constant 0 : index
    %c0_15 = arith.constant 0 : index
    %39 = vector.load %arg4[%c0_14, %c0_15] : memref<8x24xf32, #tpu.memory_space<vmem>>, vector<8x24xf32>
    %cst_16 = arith.constant dense<0.000000e+00> : vector<8xf32>
    %40 = vector.multi_reduction <add>, %37, %cst_16 [1] : vector<8x128xf32> to vector<8xf32>
    %41 = vector.shape_cast %40 : vector<8xf32> to vector<8x1xf32>
    %cst_17 = arith.constant 1.280000e+02 : f32
    %42 = vector.broadcast %cst_17 : f32 to vector<8x1xf32>
    %43 = arith.divf %41, %42 : vector<8x1xf32>
    %44 = vector.broadcast %43 : vector<8x1xf32> to vector<8x128xf32>
    %45 = arith.subf %37, %44 : vector<8x128xf32>
    %46 = arith.mulf %45, %45 : vector<8x128xf32>
    %cst_18 = arith.constant dense<0.000000e+00> : vector<8xf32>
    %47 = vector.multi_reduction <add>, %46, %cst_18 [1] : vector<8x128xf32> to vector<8xf32>
    %48 = vector.shape_cast %47 : vector<8xf32> to vector<8x1xf32>
    %cst_19 = arith.constant 1.280000e+02 : f32
    %49 = vector.broadcast %cst_19 : f32 to vector<8x1xf32>
    %50 = arith.divf %48, %49 : vector<8x1xf32>
    %cst_20 = arith.constant 9.99999974E-6 : f32
    %51 = vector.broadcast %cst_20 : f32 to vector<8x1xf32>
    %52 = arith.addf %50, %51 : vector<8x1xf32>
    %53 = math.rsqrt %52 : vector<8x1xf32>
    %54 = vector.broadcast %53 : vector<8x1xf32> to vector<8x128xf32>
    %55 = arith.mulf %45, %54 : vector<8x128xf32>
    %56 = arith.negf %55 : vector<8x128xf32>
    %57 = math.exp %56 : vector<8x128xf32>
    %cst_21 = arith.constant 1.000000e+00 : f32
    %58 = vector.broadcast %cst_21 : f32 to vector<8x128xf32>
    %59 = arith.addf %58, %57 : vector<8x128xf32>
    %60 = arith.divf %58, %59 : vector<8x128xf32>
    %61 = arith.mulf %55, %60 : vector<8x128xf32>
    %c1_i32_22 = arith.constant 1 : i32
    %62 = tpu.dynamic_rotate %61 by %c1_i32_22 dim 1 : vector<8x128xf32>, i32 -> vector<8x128xf32>
    %63 = vector.broadcast %0 : vector<1x128xf32> to vector<8x128xf32>
    %64 = arith.mulf %62, %63 : vector<8x128xf32>
    %c127_i32_23 = arith.constant 127 : i32
    %65 = tpu.dynamic_rotate %61 by %c127_i32_23 dim 1 : vector<8x128xf32>, i32 -> vector<8x128xf32>
    %66 = vector.broadcast %1 : vector<1x128xf32> to vector<8x128xf32>
    %67 = arith.mulf %65, %66 : vector<8x128xf32>
    %68 = tpu.concatenate %64, %61, %67 in 0 : vector<8x128xf32>, vector<8x128xf32>, vector<8x128xf32> -> vector<24x128xf32>
    %cst_24 = arith.constant dense<0.000000e+00> : vector<8x128xf32>
    %69 = tpu.matmul %39, %68, %cst_24 {dimension_numbers = #tpu.dot_dimension_numbers<[1], [0], [0], [1], [0, 0, 1, 1], [], []>} : vector<8x24xf32>, vector<24x128xf32>, vector<8x128xf32> -> vector<8x128xf32>
    %c0_25 = arith.constant 0 : index
    %c0_26 = arith.constant 0 : index
    %70 = vector.load %arg5[%c0_25, %c0_26] : memref<8x1xf32, #tpu.memory_space<vmem>>, vector<8x1xf32>
    %71 = vector.broadcast %70 : vector<8x1xf32> to vector<8x128xf32>
    %72 = arith.addf %69, %71 : vector<8x128xf32>
    %73 = arith.addf %38, %72 : vector<8x128xf32>
    %c0_27 = arith.constant 0 : index
    %c0_28 = arith.constant 0 : index
    %74 = vector.load %arg7[%c0_27, %c0_28] : memref<8x128xf32, #tpu.memory_space<vmem>>, vector<8x128xf32>
    tpu.vector_store %arg7[%c0_27, %c0_28], %73 {strides = array<i32>} : memref<8x128xf32, #tpu.memory_space<vmem>>, vector<8x128xf32>,
    return
  }
  func.func @transform_0(%arg0: i32) -> (i32, i32) {
    %c0_i32 = arith.constant 0 : i32
    %c0_i32_0 = arith.constant 0 : i32
    return %c0_i32, %arg0 : i32, i32
  }
  func.func @transform_1(%arg0: i32) -> (i32, i32) {
    %c0_i32 = arith.constant 0 : i32
    %c0_i32_0 = arith.constant 0 : i32
    %c0_i32_1 = arith.constant 0 : i32
    return %c0_i32, %c0_i32_0 : i32, i32
  }
  func.func @transform_2(%arg0: i32) -> (i32, i32) {
    %c0_i32 = arith.constant 0 : i32
    %c0_i32_0 = arith.constant 0 : i32
    %c0_i32_1 = arith.constant 0 : i32
    return %c0_i32, %c0_i32_0 : i32, i32
  }
  func.func @transform_3(%arg0: i32) -> (i32, i32) {
    %c0_i32 = arith.constant 0 : i32
    %c0_i32_0 = arith.constant 0 : i32
    %c0_i32_1 = arith.constant 0 : i32
    return %c0_i32, %c0_i32_0 : i32, i32
  }
  func.func @transform_4(%arg0: i32) -> (i32, i32) {
    %c0_i32 = arith.constant 0 : i32
    %c0_i32_0 = arith.constant 0 : i32
    %c0_i32_1 = arith.constant 0 : i32
    return %c0_i32, %c0_i32_0 : i32, i32
  }
  func.func @transform_5(%arg0: i32) -> (i32, i32) {
    %c0_i32 = arith.constant 0 : i32
    %c0_i32_0 = arith.constant 0 : i32
    %c0_i32_1 = arith.constant 0 : i32
    return %c0_i32, %c0_i32_0 : i32, i32
  }
  func.func @transform_6(%arg0: i32) -> (i32, i32) {
    %c0_i32 = arith.constant 0 : i32
    %c0_i32_0 = arith.constant 0 : i32
    return %c0_i32, %arg0 : i32, i32
  }
}

module attributes {stable_mosaic.version = 11 : i64} {
  func.func @residual_kernel(%arg0: i32, %arg1: memref<8x128xf32, #tpu.memory_space<vmem>>, %arg2: memref<16x24xf32, #tpu.memory_space<vmem>>, %arg3: memref<16x1xf32, #tpu.memory_space<vmem>>, %arg4: memref<8x24xf32, #tpu.memory_space<vmem>>, %arg5: memref<8x1xf32, #tpu.memory_space<vmem>>, %arg6: memref<2x128xf32, #tpu.memory_space<vmem>>, %arg7: memref<8x128xf32, #tpu.memory_space<vmem>>) attributes {dimension_semantics = [#tpu.dimension_semantics<parallel>], iteration_bounds = array<i64: 2>, scalar_prefetch = 0 : i64, scratch_operands = 0 : i64, tpu.core_type = #tpu.core_type<tc>, window_params = [{transform_indices = @transform_0, window_bounds = array<i64: 8, 128>}, {pipeline_mode = #tpu.pipeline_mode<synchronous>, transform_indices = @transform_1, window_bounds = array<i64: 16, 24>}, {pipeline_mode = #tpu.pipeline_mode<synchronous>, transform_indices = @transform_2, window_bounds = array<i64: 16, 1>}, {pipeline_mode = #tpu.pipeline_mode<synchronous>, transform_indices = @transform_3, window_bounds = array<i64: 8, 24>}, {pipeline_mode = #tpu.pipeline_mode<synchronous>, transform_indices = @transform_4, window_bounds = array<i64: 8, 1>}, {pipeline_mode = #tpu.pipeline_mode<synchronous>, transform_indices = @transform_5, window_bounds = array<i64: 2, 128>}, {transform_indices = @transform_6, window_bounds = array<i64: 8, 128>}]} {
    %c0 = arith.constant 0 : index
    %c0_0 = arith.constant 0 : index
    %0 = vector.load %arg6[%c0, %c0_0] : memref<2x128xf32, #tpu.memory_space<vmem>>, vector<1x128xf32>
    %c1 = arith.constant 1 : index
    %c0_1 = arith.constant 0 : index
    %1 = vector.load %arg6[%c1, %c0_1] : memref<2x128xf32, #tpu.memory_space<vmem>>, vector<1x128xf32>
    %c0_2 = arith.constant 0 : index
    %c0_3 = arith.constant 0 : index
    %2 = vector.load %arg1[%c0_2, %c0_3] : memref<8x128xf32, #tpu.memory_space<vmem>>, vector<8x128xf32>
    %cst = arith.constant dense<0.000000e+00> : vector<8xf32>
    %3 = vector.multi_reduction <add>, %2, %cst [1] : vector<8x128xf32> to vector<8xf32>
    %4 = vector.shape_cast %3 : vector<8xf32> to vector<8x1xf32>
    %cst_4 = arith.constant 1.280000e+02 : f32
    %5 = vector.broadcast %cst_4 : f32 to vector<8x1xf32>
    %6 = arith.divf %4, %5 : vector<8x1xf32>
    %7 = vector.broadcast %6 : vector<8x1xf32> to vector<8x128xf32>
    %8 = arith.subf %2, %7 : vector<8x128xf32>
    %9 = arith.mulf %8, %8 : vector<8x128xf32>
    %cst_5 = arith.constant dense<0.000000e+00> : vector<8xf32>
    %10 = vector.multi_reduction <add>, %9, %cst_5 [1] : vector<8x128xf32> to vector<8xf32>
    %11 = vector.shape_cast %10 : vector<8xf32> to vector<8x1xf32>
    %cst_6 = arith.constant 1.280000e+02 : f32
    %12 = vector.broadcast %cst_6 : f32 to vector<8x1xf32>
    %13 = arith.divf %11, %12 : vector<8x1xf32>
    %cst_7 = arith.constant 9.99999974E-6 : f32
    %14 = vector.broadcast %cst_7 : f32 to vector<8x1xf32>
    %15 = arith.addf %13, %14 : vector<8x1xf32>
    %16 = math.rsqrt %15 : vector<8x1xf32>
    %17 = vector.broadcast %16 : vector<8x1xf32> to vector<8x128xf32>
    %18 = arith.mulf %8, %17 : vector<8x128xf32>
    %19 = arith.negf %18 : vector<8x128xf32>
    %20 = math.exp %19 : vector<8x128xf32>
    %cst_8 = arith.constant 1.000000e+00 : f32
    %21 = vector.broadcast %cst_8 : f32 to vector<8x128xf32>
    %22 = arith.addf %21, %20 : vector<8x128xf32>
    %23 = arith.divf %21, %22 : vector<8x128xf32>
    %24 = arith.mulf %18, %23 : vector<8x128xf32>
    %c0_9 = arith.constant 0 : index
    %c0_10 = arith.constant 0 : index
    %25 = vector.load %arg2[%c0_9, %c0_10] : memref<16x24xf32, #tpu.memory_space<vmem>>, vector<16x24xf32>
    %c1_i32 = arith.constant 1 : i32
    %26 = tpu.dynamic_rotate %24 by %c1_i32 dim 1 : vector<8x128xf32>, i32 -> vector<8x128xf32>
    %27 = vector.broadcast %0 : vector<1x128xf32> to vector<8x128xf32>
    %28 = arith.mulf %26, %27 : vector<8x128xf32>
    %c127_i32 = arith.constant 127 : i32
    %29 = tpu.dynamic_rotate %24 by %c127_i32 dim 1 : vector<8x128xf32>, i32 -> vector<8x128xf32>
    %30 = vector.broadcast %1 : vector<1x128xf32> to vector<8x128xf32>
    %31 = arith.mulf %29, %30 : vector<8x128xf32>
    %32 = tpu.concatenate %28, %24, %31 in 0 : vector<8x128xf32>, vector<8x128xf32>, vector<8x128xf32> -> vector<24x128xf32>
    %cst_11 = arith.constant dense<0.000000e+00> : vector<16x128xf32>
    %33 = tpu.matmul %25, %32, %cst_11 {dimension_numbers = #tpu.dot_dimension_numbers<[1], [0], [0], [1], [0, 0, 1, 1], [], []>} : vector<16x24xf32>, vector<24x128xf32>, vector<16x128xf32> -> vector<16x128xf32>
    %c0_12 = arith.constant 0 : index
    %c0_13 = arith.constant 0 : index
    %34 = vector.load %arg3[%c0_12, %c0_13] : memref<16x1xf32, #tpu.memory_space<vmem>>, vector<16x1xf32>
    %35 = vector.broadcast %34 : vector<16x1xf32> to vector<16x128xf32>
    %36 = arith.addf %33, %35 : vector<16x128xf32>
    %37 = vector.extract_strided_slice %36 {offsets = [0, 0], sizes = [8, 128], strides = [1, 1]} : vector<16x128xf32> to vector<8x128xf32>
    %38 = vector.extract_strided_slice %36 {offsets = [8, 0], sizes = [8, 128], strides = [1, 1]} : vector<16x128xf32> to vector<8x128xf32>
    %c0_14 = arith.constant 0 : index
    %c0_15 = arith.constant 0 : index
    %39 = vector.load %arg4[%c0_14, %c0_15] : memref<8x24xf32, #tpu.memory_space<vmem>>, vector<8x24xf32>
    %cst_16 = arith.constant dense<0.000000e+00> : vector<8xf32>
    %40 = vector.multi_reduction <add>, %37, %cst_16 [1] : vector<8x128xf32> to vector<8xf32>
    %41 = vector.shape_cast %40 : vector<8xf32> to vector<8x1xf32>
    %cst_17 = arith.constant 1.280000e+02 : f32
    %42 = vector.broadcast %cst_17 : f32 to vector<8x1xf32>
    %43 = arith.divf %41, %42 : vector<8x1xf32>
    %44 = vector.broadcast %43 : vector<8x1xf32> to vector<8x128xf32>
    %45 = arith.subf %37, %44 : vector<8x128xf32>
    %46 = arith.mulf %45, %45 : vector<8x128xf32>
    %cst_18 = arith.constant dense<0.000000e+00> : vector<8xf32>
    %47 = vector.multi_reduction <add>, %46, %cst_18 [1] : vector<8x128xf32> to vector<8xf32>
    %48 = vector.shape_cast %47 : vector<8xf32> to vector<8x1xf32>
    %cst_19 = arith.constant 1.280000e+02 : f32
    %49 = vector.broadcast %cst_19 : f32 to vector<8x1xf32>
    %50 = arith.divf %48, %49 : vector<8x1xf32>
    %cst_20 = arith.constant 9.99999974E-6 : f32
    %51 = vector.broadcast %cst_20 : f32 to vector<8x1xf32>
    %52 = arith.addf %50, %51 : vector<8x1xf32>
    %53 = math.rsqrt %52 : vector<8x1xf32>
    %54 = vector.broadcast %53 : vector<8x1xf32> to vector<8x128xf32>
    %55 = arith.mulf %45, %54 : vector<8x128xf32>
    %56 = arith.negf %55 : vector<8x128xf32>
    %57 = math.exp %56 : vector<8x128xf32>
    %cst_21 = arith.constant 1.000000e+00 : f32
    %58 = vector.broadcast %cst_21 : f32 to vector<8x128xf32>
    %59 = arith.addf %58, %57 : vector<8x128xf32>
    %60 = arith.divf %58, %59 : vector<8x128xf32>
    %61 = arith.mulf %55, %60 : vector<8x128xf32>
    %c1_i32_22 = arith.constant 1 : i32
    %62 = tpu.dynamic_rotate %61 by %c1_i32_22 dim 1 : vector<8x128xf32>, i32 -> vector<8x128xf32>
    %63 = vector.broadcast %0 : vector<1x128xf32> to vector<8x128xf32>
    %64 = arith.mulf %62, %63 : vector<8x128xf32>
    %c127_i32_23 = arith.constant 127 : i32
    %65 = tpu.dynamic_rotate %61 by %c127_i32_23 dim 1 : vector<8x128xf32>, i32 -> vector<8x128xf32>
    %66 = vector.broadcast %1 : vector<1x128xf32> to vector<8x128xf32>
    %67 = arith.mulf %65, %66 : vector<8x128xf32>
    %68 = tpu.concatenate %64, %61, %67 in 0 : vector<8x128xf32>, vector<8x128xf32>, vector<8x128xf32> -> vector<24x128xf32>
    %cst_24 = arith.constant dense<0.000000e+00> : vector<8x128xf32>
    %69 = tpu.matmul %39, %68, %cst_24 {dimension_numbers = #tpu.dot_dimension_numbers<[1], [0], [0], [1], [0, 0, 1, 1], [], []>} : vector<8x24xf32>, vector<24x128xf32>, vector<8x128xf32> -> vector<8x128xf32>
    %c0_25 = arith.constant 0 : index
    %c0_26 = arith.constant 0 : index
    %70 = vector.load %arg5[%c0_25, %c0_26] : memref<8x1xf32, #tpu.memory_space<vmem>>, vector<8x1xf32>
    %71 = vector.broadcast %70 : vector<8x1xf32> to vector<8x128xf32>
    %72 = arith.addf %69, %71 : vector<8x128xf32>
    %73 = arith.addf %38, %72 : vector<8x128xf32>
    %c0_27 = arith.constant 0 : index
    %c0_28 = arith.constant 0 : index
    %74 = vector.load %arg7[%c0_27, %c0_28] : memref<8x128xf32, #tpu.memory_space<vmem>>, vector<8x128xf32>
    tpu.vector_store %arg7[%c0_27, %c0_28], %73 {strides = array<i32>} : memref<8x128xf32, #tpu.memory_space<vmem>>, vector<8x128xf32>,
    return
  }
  func.func @transform_0(%arg0: i32) -> (i32, i32) {
    %c0_i32 = arith.constant 0 : i32
    %c0_i32_0 = arith.constant 0 : i32
    return %c0_i32, %arg0 : i32, i32
  }
  func.func @transform_1(%arg0: i32) -> (i32, i32) {
    %c0_i32 = arith.constant 0 : i32
    %c0_i32_0 = arith.constant 0 : i32
    %c0_i32_1 = arith.constant 0 : i32
    return %c0_i32, %c0_i32_0 : i32, i32
  }
  func.func @transform_2(%arg0: i32) -> (i32, i32) {
    %c0_i32 = arith.constant 0 : i32
    %c0_i32_0 = arith.constant 0 : i32
    %c0_i32_1 = arith.constant 0 : i32
    return %c0_i32, %c0_i32_0 : i32, i32
  }
  func.func @transform_3(%arg0: i32) -> (i32, i32) {
    %c0_i32 = arith.constant 0 : i32
    %c0_i32_0 = arith.constant 0 : i32
    %c0_i32_1 = arith.constant 0 : i32
    return %c0_i32, %c0_i32_0 : i32, i32
  }
  func.func @transform_4(%arg0: i32) -> (i32, i32) {
    %c0_i32 = arith.constant 0 : i32
    %c0_i32_0 = arith.constant 0 : i32
    %c0_i32_1 = arith.constant 0 : i32
    return %c0_i32, %c0_i32_0 : i32, i32
  }
  func.func @transform_5(%arg0: i32) -> (i32, i32) {
    %c0_i32 = arith.constant 0 : i32
    %c0_i32_0 = arith.constant 0 : i32
    %c0_i32_1 = arith.constant 0 : i32
    return %c0_i32, %c0_i32_0 : i32, i32
  }
  func.func @transform_6(%arg0: i32) -> (i32, i32) {
    %c0_i32 = arith.constant 0 : i32
    %c0_i32_0 = arith.constant 0 : i32
    return %c0_i32, %arg0 : i32, i32
  }
}

</mosaic_0001>

<bundles_post_ra>
// kernel: tpu_custom_call.1
= control target key start
LH: loop header
LB: loop body
LE: loop exit
PB: predicated region body
PF: predicated region fallthrough
CT: control target
= control target key end

     0   :  { %11 = vsyncpa [#allocation3], 0  ;;  %s1010_s0 = inlined_call_operand.vmem [shape: f32[8,256], index: 0, kind: input, shape index: {}]   ;;  %s1011_s1 = inlined_call_operand.hbm [shape: f32[16,24], index: 1, kind: input, shape index: {}]   ;;  %s1012_s2 = inlined_call_operand.vmem [shape: f32[16,1], index: 2, kind: input, shape index: {}]   ;;  %s1013_s3 = inlined_call_operand.vmem [shape: f32[8,24], index: 3, kind: input, shape index: {}]   ;;  %s1014_s4 = inlined_call_operand.vmem [shape: f32[8,1], index: 4, kind: input, shape index: {}]   ;;  %s1015_s5 = inlined_call_operand.vmem [shape: f32[2,128], index: 5, kind: input, shape index: {}]   ;;  %s1016_s6 = inlined_call_operand.hbm [shape: f32[8,256], index: 6, kind: output, shape index: {}]  }
   0x1   :  { %12 = vsyncpa [#allocation4], 0 }
   0x2   :  { %14 = vsyncpa [#allocation4 + $0x1], 0  ;;  %s850_s21 = smov 0   ;;  %s852_s22 = smov 0  }
   0x3   :  { %s854_s23 = smov 0   ;;  %s856_s24 = smov 0  }
   0x4 LB: > { %s871_s25 = sadd.s32 4294967295, %s803_s24   ;;  %s585_s26 = sadd.s32 4294967294, %s803_s24   ;;  %s803_s24 = sphi %s856_s24, %s1032_s24   ;;  %s799_s23 = sphi %s854_s23, %s1031_s23   ;;  %s795_s22 = sphi %s852_s22, %s1030_s22   ;;  %s791_s21 = sphi %s850_s21, %s1029_s21  }
   0x5   : > { %s875_s27 = sadd.s32 1, %s803_s24   ;;  %s158_s28 = sadd.s32 1, %s799_s23 }
   0x6   : > { %s155_s29 = ssub.s32 %s803_s24, %s875_s27  ;;  %p168_p0 = scmp.ne.s32.totalorder %s799_s23, %s795_s22 }
   0x7   : > { %p156_p1 = scmp.eq.s32.totalorder %s155_s29, 0  ;;  %p169_p2 = scmp.eq.s32.totalorder %s871_s25, 1 }
   0x8   : > { %p174_p3 = scmp.ne.s32.totalorder %s795_s22, %s791_s21  ;;  %p175_p4 = scmp.eq.s32.totalorder %s585_s26, 1 }
   0x9   : > { %s886_s30 = scalar_select %p156_p1, %s799_s23, %s158_s28  }
   0xa   : > { %p888_p5 = por %p169_p2, %p168_p0  ;;  %p892_p6 = por %p175_p4, %p174_p3 }
   0xb   : > { %p586_p7 = scmp.ge.s32.totalorder %s803_s24, 1  ;;  %p182_p8 = scmp.lt.s32.totalorder %s803_s24, 3 }
   0xc   : > { %s1020_s7 = scalar_select %p888_p5, 1, 0 }
   0xd   : > { %s1021_s8 = scalar_select %p892_p6, 1, 0 }
   0xe   : > { %p1017_p9 = scmp.eq.s32.totalorder %s871_s25, 0  ;;  %p899_p10 = pnand %p586_p7, %p182_p8 }
   0xf   : > { %s805_s10 = smov [#allocation2]   ;;  %s709_s15 = scalar_lea.hbm %s1011_s1, 256 }
  0x10   : > { %s1022_s9 = scalar_select %p899_p10, 1, 0 }
  0x11   : > { %s194_s11 = sshll.u32 %s805_s10, 4  ;;  %p644_p11 = pneg %p899_p10  ;;  %s195_s11 = int_to_ptr.vmem [resolvable:$true] %s194_s11 }
  0x12   : > { %p710_p13 = scmp.ne.s32.totalorder %s1011_s1, %s709_s15  ;;  %p716_p3 = scmp.lt.u32.totalorder %s709_s15, %s1011_s1 }
  0x13   : > { %p907_p12 = pnand %p1017_p9, %p644_p11 }
  0x15   : > { %p711_p0 = pneg %p907_p12 }
  0x17   : > { %p712_p1 = pnand %p711_p0, %p710_p13 }
  0x19   : > { %p713_p2 = pneg %p712_p1 }
  0x1b   : > { %p718_p4 = pnand %p716_p3, %p713_p2 }
  0x1d   : > { %721 = shalt.err (!%p718_p4)
}
  0x1e   : > { %s722_s20 = scalar_lea.vmem %s195_s11, 256  ;;  %p730_p9 = scmp.lt.s32.totalorder %s195_s11, %s195_s11 }
  0x1f   : > { %p723_p7 = scmp.ne.s32.totalorder %s195_s11, %s722_s20  ;;  %p731_p6 = scmp.lt.s32.totalorder %s722_s20, %s722_s20 }
  0x21   : > { %p725_p8 = pnand %p723_p7, %p711_p0  ;;  %p732_p5 = por %p731_p6, %p730_p9 }
  0x23   : > { %p726_p11 = pneg %p725_p8 }
  0x25   : > { %p733_p10 = pnand %p732_p5, %p726_p11 }
  0x27   : > { %736 = shalt.err (!%p733_p10)
}
  0x28   : > { %s806_s26 = smov 128   ;;  %s807_s28 = smov 8  }
  0x29   : > { %647 = dma.hbm_to_vmem [thread:$0]  (!%p907_p12), %s1011_s1, 256, %s195_s11, [#allocation3], %s806_s26, %s806_s26, %s807_s28  }
  0x2a   : > { %p1024_p13 = scmp.ne.s32.totalorder %s1022_s9, 0 }
  0x2b   : > { %p1025_p1 = scmp.eq.s32.totalorder (!%p1024_p13), %s871_s25, 0 }
  0x2c   : > { %229 = sbr.rel (%p1024_p13) target bundleno = 1423 (0x58f), region = 44 }
  0x33   : > { %782 = dma.done.wait (%p1025_p1), [#allocation3], 256   ;;  %p1026_p0 = pmov %p1025_p1 }
  0x34   : > { %p258_p5 = scmp.lt.s32.totalorder %s871_s25, 1  ;;  %v284_v13 = vld [vmem:[#allocation2] sm:$0xff]  ;;  %vm312_vm0 = vcmask 195584   ;;  %v808_v17 = vmov 0   ;;  %s809_s17 = smov 1   ;;  %v285_v25 = vld [vmem:[#allocation2 + $0x8] sm:$0xff] }
  0x35   : > { %784 = vsyncadd (%p1026_p0), [#allocation3], 4294967040  ;;  %619 = vmatprep.mubr.msk.f32.mxu0 %vm312_vm0, %v284_v13  ;;  %v300_v15 = vld [vmem:[%s1012_s2] sm:$0xff]  ;;  %696 = vset.pattern.permute.xlu0 %v808_v17  ;;  %s810_s18 = smov 127   ;;  %v811_v42 = vmov 0.0|0.0   ;;  %vm812_vm1 = vmmov 0  }
  0x36   : > { %s259_s13 = scalar_select %p258_p5, %s871_s25, 1  ;;  %v594_v18 = vld [vmem:[%s1015_s5] ss:$0 sm:$0xff]  ;;  %v595_v21 = vld [vmem:[%s1015_s5 + $0x1] ss:$0 sm:$0xff]  ;;  %635 = vmatprep.subr.bf16.mxu1 %v811_v42  ;;  %v813_v43 = vmov 0.0  }
  0x37   : > { %628 = vmatprep.mubr.msk.f32.mxu1 %vm812_vm1, %v813_v43  ;;  %v301_v46 = vld [vmem:[%s1012_s2 + $0x8] sm:$0xff]  ;;  %v419_v47 = vld [vmem:[%s1014_s4] sm:$0xff]  ;;  %s601_s11 = sshll.u32 %s871_s25, 7  ;;  %p1027_p9 = scmp.ne.s32.totalorder %s1020_s7, 0 }
  0x38   : > { %s592_s14 = sshll.u32 %s259_s13, 3  ;;  %v394_v53 = vld [vmem:[%s1013_s3] sm:$0xff]  ;;  %s968_s26 = scalar_lea.hbm %s1016_s6, %s601_s11 }
  0x39   : > { %s261_s16 = scalar_lea.vmem %s1010_s0, %s592_s14  ;;  %s814_s25 = smov [#allocation5]  }
  0x3a   : > { %v264_v0 = vld [vmem:[%s261_s16] sm:$0xff]  ;;  %s255_s16 = sand.u32 1, %s795_s22   ;;  %s741_s10 = sshll.u32 %s814_s25, 4  ;;  %s742_s10 = int_to_ptr.vmem [resolvable:$false] %s741_s10 }
  0x3b   : > { %265 = vadd.xlane.f32.xlu0 %v264_v0  ;;  %s591_s9 = sshll.u32 %s255_s16, 3  ;;  %s501_s28 = scalar_lea.sflag [#allocation4], %s255_s16 }
  0x3c   : > { %s743_s13 = scalar_lea.vmem %s742_s10, 256 }
  0xc8   : > { %v266_v1 = vpop.xlane.xlu0 %265 }
  0xc9   : > { %v268_v2 = vmul.f32 0.0078125, %v266_v1 }
  0xcb   : > { %v269_v3 = vsub.f32 %v264_v0, %v268_v2 }
  0xcd   : > { %v270_v4 = vmul.f32 %v269_v3, %v269_v3 }
  0xcf   : > { %271 = vadd.xlane.f32.xlu0 %v270_v4 }
  0xe5   : > { %304 = vperm.xlu0 %696, %v300_v15  }
 0x15c   : > { %v272_v5 = vpop.xlane.xlu0 %271 }
 0x15d   : > { %v273_v6 = vmul.f32 0.0078125, %v272_v5 }
 0x15f   : > { %v274_v7 = vadd.f32 1e-05, %v273_v6 }
 0x161   : > { %697 = vrsqrt.f32 %v274_v7 }
 0x164   : > { %v305_v26 = vpop.permute.xlu0 %304 }
 0x16b   : > { %v698_v8 = vpop.eup %697 }
 0x16c   : > { %v276_v9 = vmul.f32 %v698_v8, %v269_v3 }
 0x16e   : > { %v593_v10 = vmul.f32 -1.442695, %v276_v9 }
 0x170   : > { %699 = vpow2.f32 %v593_v10 }
 0x17a   : > { %v700_v11 = vpop.eup %699 }
 0x17b   : > { %v280_v12 = vadd.f32 1.0, %v700_v11 }
 0x17d   : > { %701 = vrcp.f32 %v280_v12 }
 0x187   : > { %v702_v14 = vpop.eup %701 }
 0x188   : > { %v283_v16 = vmul.f32 %v702_v14, %v276_v9 }
 0x18a   : > { %286 = vrot.lane.b32.xlu1 %v283_v16, %s809_s17 }
 0x18e   : > { %293 = vrot.lane.b32.xlu1 %v283_v16, %s810_s18 }
 0x1fc   : > { %v287_v19 = vpop.permute.xlu1 %286 }
 0x1fd   : > { %v292_v20 = vmul.f32 %v594_v18, %v287_v19 }
 0x1ff   : > { %v631_v22 = vpack.c.bf16 %v283_v16, %v292_v20 }
 0x200   : > { %v294_v23 = vpop.permute.xlu1 %293 }
 0x201   : > { %v299_v24 = vmul.f32 %v595_v21, %v294_v23  ;;  %632 = vmatprep.subr.bf16.mxu0 %v631_v22 }
 0x202   : > { %634 = vmatpush3.bf16.msra.mxu0 %v631_v22 }
 0x203   : > { %617 = vmatprep.subr.mxu0 %v299_v24 }
 0x206   : > { %618 = vmatpush3.msra.mxu0 %v299_v24 }
 0x207   : > { %620 = vmatmul.mubr.msk.f32.vlgmr.msra.gmra.mrb[0].mxu0 %vm312_vm0, %v285_v25 }
 0x2da   : > { %v621_v27 = vpop.f32.mrb[0].mxu0 }
 0x2db   : > { %v385_v28 = vpop.f32.mrb[1].mxu0 }
 0x2dc   : > { %v386_v29 = vadd.f32 %v385_v28, %v305_v26 }
 0x2de   : > { %395 = vadd.xlane.f32.xlu1 %v386_v29 }
 0x36b   : > { %v396_v30 = vpop.xlane.xlu1 %395 }
 0x36c   : > { %v397_v31 = vmul.f32 0.0078125, %v396_v30 }
 0x36e   : > { %v398_v32 = vsub.f32 %v386_v29, %v397_v31 }
 0x370   : > { %v399_v33 = vmul.f32 %v398_v32, %v398_v32 }
 0x372   : > { %400 = vadd.xlane.f32.xlu1 %v399_v33 }
 0x3ff   : > { %v401_v34 = vpop.xlane.xlu1 %400 }
 0x400   : > { %v402_v35 = vmul.f32 0.0078125, %v401_v34 }
 0x402   : > { %v403_v36 = vadd.f32 1e-05, %v402_v35 }
 0x404   : > { %703 = vrsqrt.f32 %v403_v36 }
 0x40e   : > { %v704_v37 = vpop.eup %703 }
 0x40f   : > { %v405_v38 = vmul.f32 %v704_v37, %v398_v32 }
 0x411   : > { %v598_v39 = vmul.f32 -1.442695, %v405_v38 }
 0x413   : > { %705 = vpow2.f32 %v598_v39 }
 0x41d   : > { %v706_v40 = vpop.eup %705 }
 0x41e   : > { %v409_v41 = vadd.f32 1.0, %v706_v40 }
 0x420   : > { %707 = vrcp.f32 %v409_v41 }
 0x42a   : > { %v708_v44 = vpop.eup %707 }
 0x42b   : > { %v412_v45 = vmul.f32 %v708_v44, %v405_v38 }
 0x42d   : > { %416 = vrot.lane.b32.xlu0 %v412_v45, %s810_s18  ;;  %413 = vrot.lane.b32.xlu1 %v412_v45, %s809_s17  ;;  %s257_s17 = scalar_lea.vmem [#allocation5], %s591_s9 }
 0x42e   : > { %s514_s18 = sshll.u32 %s257_s17, 4  ;;  %s970_s18 = int_to_ptr.vmem [resolvable:$true] %s514_s18 }
 0x42f   : > { %s737_s29 = scalar_lea.vmem %s970_s18, 128  ;;  %p744_p2 = scmp.lt.s32.totalorder %s970_s18, %s742_s10 }
 0x430   : > { %p738_p6 = scmp.ne.s32.totalorder %s970_s18, %s737_s29  ;;  %p745_p3 = scmp.lt.s32.totalorder %s743_s13, %s737_s29 }
 0x431   : > { %309 = vperm.xlu0 %696, %v301_v46  }
 0x432   : > { %p739_p10 = pnand %p738_p6, %p1027_p9  ;;  %p746_p4 = por %p745_p3, %p744_p2 }
 0x434   : > { %p740_p12 = pneg %p739_p10 }
 0x435   : > { %422 = vperm.xlu0 %696, %v419_v47  }
 0x436   : > { %p747_p7 = pnand %p746_p4, %p740_p12 }
 0x49f   : > { %v414_v48 = vpop.permute.xlu1 %413  ;;  %v417_v51 = vpop.permute.xlu0 %416 }
 0x4a0   : > { %v415_v49 = vmul.f32 %v594_v18, %v414_v48  ;;  %v418_v52 = vmul.f32 %v595_v21, %v417_v51 }
 0x4a2   : > { %v636_v50 = vpack.c.bf16 %v412_v45, %v415_v49 }
 0x4a4   : > { %637 = vmatpush3.bf16.msra.mxu1 %v636_v50 }
 0x4a5   : > { %626 = vmatprep.subr.mxu1 %v813_v43 }
 0x4a8   : > { %627 = vmatpush3.msra.mxu1 %v418_v52 }
 0x4a9   : > { %629 = vmatmul.mubr.msk.f32.vlgmr.msra.gmra.mrb[0].mxu1 %vm312_vm0, %v394_v53 }
 0x4b0   : > { %v310_v54 = vpop.permute.xlu0 %309 }
 0x4b1   : > { %v391_v57 = vadd.f32 %v621_v27, %v310_v54 }
 0x4b4   : > { %v423_v55 = vpop.permute.xlu0 %422 }
 0x57c   : > { %v494_v56 = vpop.f32.mrb[0].mxu1 }
 0x57d   : > { %v495_v58 = vadd.f32 %v494_v56, %v423_v55  ;;  %v630_v59 = vpop.f32.mrb[1].mxu1 }
 0x57f   : > { %v498_v60 = vadd.f32 %v495_v58, %v391_v57 }
 0x581   : > { %499 = vst [vmem:[%s257_s17] sm:$0xff] %v498_v60 }
 0x582   : > { %750 = shalt.err (!%p747_p7)
}
 0x583   : > { %s751_s14 = scalar_lea.hbm %s968_s26, 128  ;;  %s755_s16 = scalar_lea.hbm %s1016_s6, 256 }
 0x584   : > { %p752_p8 = scmp.ne.s32.totalorder %s968_s26, %s751_s14  ;;  %p756_p1 = scmp.lt.u32.totalorder %s968_s26, %s1016_s6 }
 0x585   : > { %p757_p0 = scmp.lt.u32.totalorder %s755_s16, %s751_s14  ;;  %p759_p6 = scmp.lt.u32.totalorder %s751_s14, %s968_s26 }
 0x586   : > { %p753_p11 = pnand %p752_p8, %p1027_p9 }
 0x587   : > { %p758_p5 = por %p757_p0, %p756_p1 }
 0x588   : > { %p754_p13 = pneg %p753_p11 }
 0x589   : > { %p760_p10 = por %p759_p6, %p758_p5 }
 0x58b   : > { %p761_p12 = pnand %p760_p10, %p754_p13 }
 0x58d   : > { %764 = shalt.err (!%p761_p12)
}
 0x58e   : > { %642 = dma.vmem_to_hbm [thread:$0]  (%p1027_p9), %s970_s18, 128, %s968_s26, %s501_s28  }
 0x58f PF: > { %p654_p2 = scmp.ge.s32.totalorder %s803_s24, 2  ;;  %s526_s17 = sand.u32 1, %s791_s21  }
 0x590   : > { %p1028_p3 = scmp.ne.s32.totalorder %s1021_s8, 0  ;;  %s527_s19 = scalar_lea.sflag [#allocation4], %s526_s17 }
 0x592   : > { %p649_p4 = pnand %p654_p2, %p1028_p3 }
 0x594   : > { %786 = dma.done.wait (!%p649_p4), %s527_s19, 128  }
 0x595   : > { %788 = vsyncadd (!%p649_p4), %s527_s19, 4294967168  ;;  %p17_p7 = scmp.ge.s32.totalorder %s875_s27, 4   ;;  %s1029_s21 = smov %s795_s22 }
 0x596   : > { %s1030_s22 = smov %s799_s23  ;;  %s1031_s23 = smov %s886_s30 }
 0x597   : > { %s1032_s24 = smov %s875_s27  ;;  %19 = sbr.rel (!%p17_p7) target bundleno = 4 (0x4), region = 84 }
 0x59e   :  { %532 = vsyncpa [#allocation3], 1 }
 0x59f   :  { %534 = vsyncpa [#allocation3 + $0x1], 1 }
 0x5a0   :  { %535 = vsyncpa [#allocation4], 1 }
 0x5a1   :  { %537 = vsyncpa [#allocation4 + $0x1], 1 }

// kernel: tpu_custom_call.1
= control target key start
LH: loop header
LB: loop body
LE: loop exit
PB: predicated region body
PF: predicated region fallthrough
CT: control target
= control target key end

     0   :  { %11 = vsyncpa [#allocation3], 0  ;;  %s1010_s0 = inlined_call_operand.vmem [shape: f32[8,256], index: 0, kind: input, shape index: {}]   ;;  %s1011_s1 = inlined_call_operand.hbm [shape: f32[16,24], index: 1, kind: input, shape index: {}]   ;;  %s1012_s2 = inlined_call_operand.vmem [shape: f32[16,1], index: 2, kind: input, shape index: {}]   ;;  %s1013_s3 = inlined_call_operand.vmem [shape: f32[8,24], index: 3, kind: input, shape index: {}]   ;;  %s1014_s4 = inlined_call_operand.vmem [shape: f32[8,1], index: 4, kind: input, shape index: {}]   ;;  %s1015_s5 = inlined_call_operand.vmem [shape: f32[2,128], index: 5, kind: input, shape index: {}]   ;;  %s1016_s6 = inlined_call_operand.hbm [shape: f32[8,256], index: 6, kind: output, shape index: {}]  }
   0x1   :  { %12 = vsyncpa [#allocation4], 0 }
   0x2   :  { %14 = vsyncpa [#allocation4 + $0x1], 0  ;;  %s850_s21 = smov 0   ;;  %s852_s22 = smov 0  }
   0x3   :  { %s854_s23 = smov 0   ;;  %s856_s24 = smov 0  }
   0x4 LB: > { %s871_s25 = sadd.s32 4294967295, %s803_s24   ;;  %s585_s26 = sadd.s32 4294967294, %s803_s24   ;;  %s803_s24 = sphi %s856_s24, %s1032_s24   ;;  %s799_s23 = sphi %s854_s23, %s1031_s23   ;;  %s795_s22 = sphi %s852_s22, %s1030_s22   ;;  %s791_s21 = sphi %s850_s21, %s1029_s21  }
   0x5   : > { %s875_s27 = sadd.s32 1, %s803_s24   ;;  %s158_s28 = sadd.s32 1, %s799_s23 }
   0x6   : > { %s155_s29 = ssub.s32 %s803_s24, %s875_s27  ;;  %p168_p0 = scmp.ne.s32.totalorder %s799_s23, %s795_s22 }
   0x7   : > { %p156_p1 = scmp.eq.s32.totalorder %s155_s29, 0  ;;  %p169_p2 = scmp.eq.s32.totalorder %s871_s25, 1 }
   0x8   : > { %p174_p3 = scmp.ne.s32.totalorder %s795_s22, %s791_s21  ;;  %p175_p4 = scmp.eq.s32.totalorder %s585_s26, 1 }
   0x9   : > { %s886_s30 = scalar_select %p156_p1, %s799_s23, %s158_s28  }
   0xa   : > { %p888_p5 = por %p169_p2, %p168_p0  ;;  %p892_p6 = por %p175_p4, %p174_p3 }
   0xb   : > { %p586_p7 = scmp.ge.s32.totalorder %s803_s24, 1  ;;  %p182_p8 = scmp.lt.s32.totalorder %s803_s24, 3 }
   0xc   : > { %s1020_s7 = scalar_select %p888_p5, 1, 0 }
   0xd   : > { %s1021_s8 = scalar_select %p892_p6, 1, 0 }
   0xe   : > { %p1017_p9 = scmp.eq.s32.totalorder %s871_s25, 0  ;;  %p899_p10 = pnand %p586_p7, %p182_p8 }
   0xf   : > { %s805_s10 = smov [#allocation2]   ;;  %s709_s15 = scalar_lea.hbm %s1011_s1, 256 }
  0x10   : > { %s1022_s9 = scalar_select %p899_p10, 1, 0 }
  0x11   : > { %s194_s11 = sshll.u32 %s805_s10, 4  ;;  %p644_p11 = pneg %p899_p10  ;;  %s195_s11 = int_to_ptr.vmem [resolvable:$true] %s194_s11 }
  0x12   : > { %p710_p13 = scmp.ne.s32.totalorder %s1011_s1, %s709_s15  ;;  %p716_p3 = scmp.lt.u32.totalorder %s709_s15, %s1011_s1 }
  0x13   : > { %p907_p12 = pnand %p1017_p9, %p644_p11 }
  0x15   : > { %p711_p0 = pneg %p907_p12 }
  0x17   : > { %p712_p1 = pnand %p711_p0, %p710_p13 }
  0x19   : > { %p713_p2 = pneg %p712_p1 }
  0x1b   : > { %p718_p4 = pnand %p716_p3, %p713_p2 }
  0x1d   : > { %721 = shalt.err (!%p718_p4)
}
  0x1e   : > { %s722_s20 = scalar_lea.vmem %s195_s11, 256  ;;  %p730_p9 = scmp.lt.s32.totalorder %s195_s11, %s195_s11 }
  0x1f   : > { %p723_p7 = scmp.ne.s32.totalorder %s195_s11, %s722_s20  ;;  %p731_p6 = scmp.lt.s32.totalorder %s722_s20, %s722_s20 }
  0x21   : > { %p725_p8 = pnand %p723_p7, %p711_p0  ;;  %p732_p5 = por %p731_p6, %p730_p9 }
  0x23   : > { %p726_p11 = pneg %p725_p8 }
  0x25   : > { %p733_p10 = pnand %p732_p5, %p726_p11 }
  0x27   : > { %736 = shalt.err (!%p733_p10)
}
  0x28   : > { %s806_s26 = smov 128   ;;  %s807_s28 = smov 8  }
  0x29   : > { %647 = dma.hbm_to_vmem [thread:$0]  (!%p907_p12), %s1011_s1, 256, %s195_s11, [#allocation3], %s806_s26, %s806_s26, %s807_s28  }
  0x2a   : > { %p1024_p13 = scmp.ne.s32.totalorder %s1022_s9, 0 }
  0x2b   : > { %p1025_p1 = scmp.eq.s32.totalorder (!%p1024_p13), %s871_s25, 0 }
  0x2c   : > { %229 = sbr.rel (%p1024_p13) target bundleno = 1423 (0x58f), region = 44 }
  0x33   : > { %782 = dma.done.wait (%p1025_p1), [#allocation3], 256   ;;  %p1026_p0 = pmov %p1025_p1 }
  0x34   : > { %p258_p5 = scmp.lt.s32.totalorder %s871_s25, 1  ;;  %v284_v13 = vld [vmem:[#allocation2] sm:$0xff]  ;;  %vm312_vm0 = vcmask 195584   ;;  %v808_v17 = vmov 0   ;;  %s809_s17 = smov 1   ;;  %v285_v25 = vld [vmem:[#allocation2 + $0x8] sm:$0xff] }
  0x35   : > { %784 = vsyncadd (%p1026_p0), [#allocation3], 4294967040  ;;  %619 = vmatprep.mubr.msk.f32.mxu0 %vm312_vm0, %v284_v13  ;;  %v300_v15 = vld [vmem:[%s1012_s2] sm:$0xff]  ;;  %696 = vset.pattern.permute.xlu0 %v808_v17  ;;  %s810_s18 = smov 127   ;;  %v811_v42 = vmov 0.0|0.0   ;;  %vm812_vm1 = vmmov 0  }
  0x36   : > { %s259_s13 = scalar_select %p258_p5, %s871_s25, 1  ;;  %v594_v18 = vld [vmem:[%s1015_s5] ss:$0 sm:$0xff]  ;;  %v595_v21 = vld [vmem:[%s1015_s5 + $0x1] ss:$0 sm:$0xff]  ;;  %635 = vmatprep.subr.bf16.mxu1 %v811_v42  ;;  %v813_v43 = vmov 0.0  }
  0x37   : > { %628 = vmatprep.mubr.msk.f32.mxu1 %vm812_vm1, %v813_v43  ;;  %v301_v46 = vld [vmem:[%s1012_s2 + $0x8] sm:$0xff]  ;;  %v419_v47 = vld [vmem:[%s1014_s4] sm:$0xff]  ;;  %s601_s11 = sshll.u32 %s871_s25, 7  ;;  %p1027_p9 = scmp.ne.s32.totalorder %s1020_s7, 0 }
  0x38   : > { %s592_s14 = sshll.u32 %s259_s13, 3  ;;  %v394_v53 = vld [vmem:[%s1013_s3] sm:$0xff]  ;;  %s968_s26 = scalar_lea.hbm %s1016_s6, %s601_s11 }
  0x39   : > { %s261_s16 = scalar_lea.vmem %s1010_s0, %s592_s14  ;;  %s814_s25 = smov [#allocation5]  }
  0x3a   : > { %v264_v0 = vld [vmem:[%s261_s16] sm:$0xff]  ;;  %s255_s16 = sand.u32 1, %s795_s22   ;;  %s741_s10 = sshll.u32 %s814_s25, 4  ;;  %s742_s10 = int_to_ptr.vmem [resolvable:$false] %s741_s10 }
  0x3b   : > { %265 = vadd.xlane.f32.xlu0 %v264_v0  ;;  %s591_s9 = sshll.u32 %s255_s16, 3  ;;  %s501_s28 = scalar_lea.sflag [#allocation4], %s255_s16 }
  0x3c   : > { %s743_s13 = scalar_lea.vmem %s742_s10, 256 }
  0xc8   : > { %v266_v1 = vpop.xlane.xlu0 %265 }
  0xc9   : > { %v268_v2 = vmul.f32 0.0078125, %v266_v1 }
  0xcb   : > { %v269_v3 = vsub.f32 %v264_v0, %v268_v2 }
  0xcd   : > { %v270_v4 = vmul.f32 %v269_v3, %v269_v3 }
  0xcf   : > { %271 = vadd.xlane.f32.xlu0 %v270_v4 }
  0xe5   : > { %304 = vperm.xlu0 %696, %v300_v15  }
 0x15c   : > { %v272_v5 = vpop.xlane.xlu0 %271 }
 0x15d   : > { %v273_v6 = vmul.f32 0.0078125, %v272_v5 }
 0x15f   : > { %v274_v7 = vadd.f32 1e-05, %v273_v6 }
 0x161   : > { %697 = vrsqrt.f32 %v274_v7 }
 0x164   : > { %v305_v26 = vpop.permute.xlu0 %304 }
 0x16b   : > { %v698_v8 = vpop.eup %697 }
 0x16c   : > { %v276_v9 = vmul.f32 %v698_v8, %v269_v3 }
 0x16e   : > { %v593_v10 = vmul.f32 -1.442695, %v276_v9 }
 0x170   : > { %699 = vpow2.f32 %v593_v10 }
 0x17a   : > { %v700_v11 = vpop.eup %699 }
 0x17b   : > { %v280_v12 = vadd.f32 1.0, %v700_v11 }
 0x17d   : > { %701 = vrcp.f32 %v280_v12 }
 0x187   : > { %v702_v14 = vpop.eup %701 }
 0x188   : > { %v283_v16 = vmul.f32 %v702_v14, %v276_v9 }
 0x18a   : > { %286 = vrot.lane.b32.xlu1 %v283_v16, %s809_s17 }
 0x18e   : > { %293 = vrot.lane.b32.xlu1 %v283_v16, %s810_s18 }
 0x1fc   : > { %v287_v19 = vpop.permute.xlu1 %286 }
 0x1fd   : > { %v292_v20 = vmul.f32 %v594_v18, %v287_v19 }
 0x1ff   : > { %v631_v22 = vpack.c.bf16 %v283_v16, %v292_v20 }
 0x200   : > { %v294_v23 = vpop.permute.xlu1 %293 }
 0x201   : > { %v299_v24 = vmul.f32 %v595_v21, %v294_v23  ;;  %632 = vmatprep.subr.bf16.mxu0 %v631_v22 }
 0x202   : > { %634 = vmatpush3.bf16.msra.mxu0 %v631_v22 }
 0x203   : > { %617 = vmatprep.subr.mxu0 %v299_v24 }
 0x206   : > { %618 = vmatpush3.msra.mxu0 %v299_v24 }
 0x207   : > { %620 = vmatmul.mubr.msk.f32.vlgmr.msra.gmra.mrb[0].mxu0 %vm312_vm0, %v285_v25 }
 0x2da   : > { %v621_v27 = vpop.f32.mrb[0].mxu0 }
 0x2db   : > { %v385_v28 = vpop.f32.mrb[1].mxu0 }
 0x2dc   : > { %v386_v29 = vadd.f32 %v385_v28, %v305_v26 }
 0x2de   : > { %395 = vadd.xlane.f32.xlu1 %v386_v29 }
 0x36b   : > { %v396_v30 = vpop.xlane.xlu1 %395 }
 0x36c   : > { %v397_v31 = vmul.f32 0.0078125, %v396_v30 }
 0x36e   : > { %v398_v32 = vsub.f32 %v386_v29, %v397_v31 }
 0x370   : > { %v399_v33 = vmul.f32 %v398_v32, %v398_v32 }
 0x372   : > { %400 = vadd.xlane.f32.xlu1 %v399_v33 }
 0x3ff   : > { %v401_v34 = vpop.xlane.xlu1 %400 }
 0x400   : > { %v402_v35 = vmul.f32 0.0078125, %v401_v34 }
 0x402   : > { %v403_v36 = vadd.f32 1e-05, %v402_v35 }
 0x404   : > { %703 = vrsqrt.f32 %v403_v36 }
 0x40e   : > { %v704_v37 = vpop.eup %703 }
 0x40f   : > { %v405_v38 = vmul.f32 %v704_v37, %v398_v32 }
 0x411   : > { %v598_v39 = vmul.f32 -1.442695, %v405_v38 }
 0x413   : > { %705 = vpow2.f32 %v598_v39 }
 0x41d   : > { %v706_v40 = vpop.eup %705 }
 0x41e   : > { %v409_v41 = vadd.f32 1.0, %v706_v40 }
 0x420   : > { %707 = vrcp.f32 %v409_v41 }
 0x42a   : > { %v708_v44 = vpop.eup %707 }
 0x42b   : > { %v412_v45 = vmul.f32 %v708_v44, %v405_v38 }
 0x42d   : > { %416 = vrot.lane.b32.xlu0 %v412_v45, %s810_s18  ;;  %413 = vrot.lane.b32.xlu1 %v412_v45, %s809_s17  ;;  %s257_s17 = scalar_lea.vmem [#allocation5], %s591_s9 }
 0x42e   : > { %s514_s18 = sshll.u32 %s257_s17, 4  ;;  %s970_s18 = int_to_ptr.vmem [resolvable:$true] %s514_s18 }
 0x42f   : > { %s737_s29 = scalar_lea.vmem %s970_s18, 128  ;;  %p744_p2 = scmp.lt.s32.totalorder %s970_s18, %s742_s10 }
 0x430   : > { %p738_p6 = scmp.ne.s32.totalorder %s970_s18, %s737_s29  ;;  %p745_p3 = scmp.lt.s32.totalorder %s743_s13, %s737_s29 }
 0x431   : > { %309 = vperm.xlu0 %696, %v301_v46  }
 0x432   : > { %p739_p10 = pnand %p738_p6, %p1027_p9  ;;  %p746_p4 = por %p745_p3, %p744_p2 }
 0x434   : > { %p740_p12 = pneg %p739_p10 }
 0x435   : > { %422 = vperm.xlu0 %696, %v419_v47  }
 0x436   : > { %p747_p7 = pnand %p746_p4, %p740_p12 }
 0x49f   : > { %v414_v48 = vpop.permute.xlu1 %413  ;;  %v417_v51 = vpop.permute.xlu0 %416 }
 0x4a0   : > { %v415_v49 = vmul.f32 %v594_v18, %v414_v48  ;;  %v418_v52 = vmul.f32 %v595_v21, %v417_v51 }
 0x4a2   : > { %v636_v50 = vpack.c.bf16 %v412_v45, %v415_v49 }
 0x4a4   : > { %637 = vmatpush3.bf16.msra.mxu1 %v636_v50 }
 0x4a5   : > { %626 = vmatprep.subr.mxu1 %v813_v43 }
 0x4a8   : > { %627 = vmatpush3.msra.mxu1 %v418_v52 }
 0x4a9   : > { %629 = vmatmul.mubr.msk.f32.vlgmr.msra.gmra.mrb[0].mxu1 %vm312_vm0, %v394_v53 }
 0x4b0   : > { %v310_v54 = vpop.permute.xlu0 %309 }
 0x4b1   : > { %v391_v57 = vadd.f32 %v621_v27, %v310_v54 }
 0x4b4   : > { %v423_v55 = vpop.permute.xlu0 %422 }
 0x57c   : > { %v494_v56 = vpop.f32.mrb[0].mxu1 }
 0x57d   : > { %v495_v58 = vadd.f32 %v494_v56, %v423_v55  ;;  %v630_v59 = vpop.f32.mrb[1].mxu1 }
 0x57f   : > { %v498_v60 = vadd.f32 %v495_v58, %v391_v57 }
 0x581   : > { %499 = vst [vmem:[%s257_s17] sm:$0xff] %v498_v60 }
 0x582   : > { %750 = shalt.err (!%p747_p7)
}
 0x583   : > { %s751_s14 = scalar_lea.hbm %s968_s26, 128  ;;  %s755_s16 = scalar_lea.hbm %s1016_s6, 256 }
 0x584   : > { %p752_p8 = scmp.ne.s32.totalorder %s968_s26, %s751_s14  ;;  %p756_p1 = scmp.lt.u32.totalorder %s968_s26, %s1016_s6 }
 0x585   : > { %p757_p0 = scmp.lt.u32.totalorder %s755_s16, %s751_s14  ;;  %p759_p6 = scmp.lt.u32.totalorder %s751_s14, %s968_s26 }
 0x586   : > { %p753_p11 = pnand %p752_p8, %p1027_p9 }
 0x587   : > { %p758_p5 = por %p757_p0, %p756_p1 }
 0x588   : > { %p754_p13 = pneg %p753_p11 }
 0x589   : > { %p760_p10 = por %p759_p6, %p758_p5 }
 0x58b   : > { %p761_p12 = pnand %p760_p10, %p754_p13 }
 0x58d   : > { %764 = shalt.err (!%p761_p12)
}
 0x58e   : > { %642 = dma.vmem_to_hbm [thread:$0]  (%p1027_p9), %s970_s18, 128, %s968_s26, %s501_s28  }
 0x58f PF: > { %p654_p2 = scmp.ge.s32.totalorder %s803_s24, 2  ;;  %s526_s17 = sand.u32 1, %s791_s21  }
 0x590   : > { %p1028_p3 = scmp.ne.s32.totalorder %s1021_s8, 0  ;;  %s527_s19 = scalar_lea.sflag [#allocation4], %s526_s17 }
 0x592   : > { %p649_p4 = pnand %p654_p2, %p1028_p3 }
 0x594   : > { %786 = dma.done.wait (!%p649_p4), %s527_s19, 128  }
 0x595   : > { %788 = vsyncadd (!%p649_p4), %s527_s19, 4294967168  ;;  %p17_p7 = scmp.ge.s32.totalorder %s875_s27, 4   ;;  %s1029_s21 = smov %s795_s22 }
 0x596   : > { %s1030_s22 = smov %s799_s23  ;;  %s1031_s23 = smov %s886_s30 }
 0x597   : > { %s1032_s24 = smov %s875_s27  ;;  %19 = sbr.rel (!%p17_p7) target bundleno = 4 (0x4), region = 84 }
 0x59e   :  { %532 = vsyncpa [#allocation3], 1 }
 0x59f   :  { %534 = vsyncpa [#allocation3 + $0x1], 1 }
 0x5a0   :  { %535 = vsyncpa [#allocation4], 1 }
 0x5a1   :  { %537 = vsyncpa [#allocation4 + $0x1], 1 }

</bundles_post_ra>
